<compile_context>
chip_gen: v7x
topology: tpu7x:2x2x1
jax: 0.10.0
libtpu: 0.0.40
codegen_flags: <defaults>
</compile_context>

<pallas_src>
import functools
import math

import jax
import jax.numpy as jnp
from jax.experimental import pallas as pl
from jax.experimental.pallas import tpu as pltpu


def _round_up(x, m):
    return ((x + m - 1) // m) * m


def _implicit_mem_kernel(q_ref, keff_ref, vaug_ref, bias_ref, out_ref, *,
                         denom_lane, exp_dtype):
    # q_ref    : [tm, d_model]      per-step tile (compute dtype, e.g. bf16)
    # keff_ref : [d_model, M_pad]   resident (pre-transposed, 1/sqrt(d_k) folded)
    # vaug_ref : [M_pad, d_pad]     resident (lane 0 = ones, lanes 1..d_v = values@Wv^T)
    # bias_ref : [1, M_pad]         resident f32 (0 real slots / -1e30 padded slots)
    # out_ref  : [tm, d_pad]

    # scores = q @ keys_eff^T  -- MXU, f32 accumulation; additive pad-slot mask.
    scores = jnp.dot(q_ref[...], keff_ref[...],
                     preferred_element_type=jnp.float32)        # [tm, M_pad]
    scores = scores + bias_ref[...]

    # Numerically stable softmax numerator; exp in bf16 on v6e/v7x (bf16 EUP).
    m = jnp.max(scores, axis=-1, keepdims=True)
    p = jnp.exp((scores - m).astype(exp_dtype))                 # [tm, M_pad]

    # pv = p @ [ones | values_eff | 0]: lane 0 carries the softmax denominator
    # (rides the MXU; no cross-lane XLU reduction over M).
    pv = jnp.dot(p.astype(vaug_ref.dtype), vaug_ref[...],
                 preferred_element_type=jnp.float32)            # [tm, d_pad]

    denom = pv[:, denom_lane:denom_lane + 1]                    # [tm, 1]
    out = pv * pl.reciprocal(denom, approx=True)                # EUP reciprocal
    out_ref[...] = out.astype(out_ref.dtype)


def _vmem_limit_bytes(tm, d_model, M_pad, d_pad, cd_bytes, out_bytes):
    # Pipelined operands are double-buffered; residents are conservatively
    # counted as double-buffered too (their block index never changes).
    q_tiles = 2 * tm * d_model * cd_bytes
    o_tiles = 2 * tm * d_pad * out_bytes
    keff = 2 * d_model * M_pad * cd_bytes
    vaug = 2 * M_pad * d_pad * cd_bytes
    bias = 2 * 8 * M_pad * 4
    # live in-kernel intermediates (scores f32, p, pv f32), x2 for compiler temps
    interm = 2 * (tm * M_pad * 4 + tm * M_pad * cd_bytes + tm * d_pad * 4)
    total = q_tiles + o_tiles + keff + vaug + bias + interm
    # generous headroom, clamped to stay well inside v7x's 64 MiB physical VMEM
    return int(min(max(2 * total, 8 * 1024 * 1024), 48 * 1024 * 1024))


def prepare_implicit_mem(keys, values, w_q, w_k, w_v, w_o, *, d_k,
                         compute_dtype=jnp.bfloat16):
    """One-time fold of the static memory + projections (eval-mode module state).

    keys/values: [M, d_model]; w_*: PyTorch nn.Linear weights [d_out, d_in]."""
    del w_o  # dead in the reference forward (its output is overwritten by dropout(attention))
    M, d_model = keys.shape
    d_v = w_v.shape[0]

    M_pad = _round_up(M, 128)            # lane-dense scores / softmax tiles
    d_pad = _round_up(d_v + 1, 128)      # +1 lane (lane 0) for the softmax denominator
    denom_lane = 0

    scale = 1.0 / math.sqrt(float(d_k))
    f32 = jnp.float32

    # keys_eff^T = scale * Wq^T @ Wk @ keys^T   ([d_model, M]); zero-pad M -> M_pad.
    keff_t = (w_q.T.astype(f32) * scale) @ w_k.astype(f32) @ keys.astype(f32).T
    keff_t = jnp.pad(keff_t, ((0, 0), (0, M_pad - M)))

    # values_aug = [ones | values @ Wv^T | 0-pad]; padded rows (slots >= M) are
    # all-zero, including the ones column, so they never touch the denominator.
    v_eff = values.astype(f32) @ w_v.astype(f32).T                    # [M, d_v]
    vaug = jnp.zeros((M_pad, d_pad), f32)
    vaug = vaug.at[:M, denom_lane].set(1.0)
    vaug = vaug.at[:M, 1:1 + d_v].set(v_eff)

    # Additive score bias: 0 for real key slots, -1e30 for padded slots.
    bias = jnp.where(jnp.arange(M_pad) < M, 0.0, -1e30).astype(f32)[None, :]

    return dict(
        keff_t=keff_t.astype(compute_dtype),
        vaug=vaug.astype(compute_dtype),
        bias=bias,
        d_model=d_model, d_v=d_v, M_pad=M_pad, d_pad=d_pad,
        denom_lane=denom_lane, compute_dtype=compute_dtype,
    )


def implicit_mem_forward(query, params, sequence_lengths=None, *,
                         tm_max=256, exp_dtype=jnp.bfloat16):
    """query: [B, T, d_model] -> [B, T, d_v]  (== dropout(attention) in eval mode)."""
    # TODO(synk): sequence_lengths is accepted but never used by the reference
    # forward (no key/sequence masking), and dropout is identity in eval mode.
    del sequence_lengths
    B, T, d_model = query.shape
    assert d_model == params["d_model"]
    d_v, M_pad, d_pad = params["d_v"], params["M_pad"], params["d_pad"]
    cd = params["compute_dtype"]

    rows = B * T
    # Row tile: floor 16 (bf16 (16,128) packing) and always >= 2 grid steps so
    # dimension_semantics=("parallel",) has work for both v7x TensorCores.
    # (On v5e prefer tm_max=128 and exp_dtype=jnp.float32.)
    if rows <= tm_max:
        tm = max(16, _round_up((rows + 1) // 2, 16))
    else:
        tm = tm_max
    rows_pad = max(_round_up(rows, tm), 2 * tm)

    q2d = query.reshape(rows, d_model)
    if rows_pad != rows:
        q2d = jnp.pad(q2d, ((0, rows_pad - rows), (0, 0)))
    q2d = q2d.astype(cd)

    grid = (rows_pad // tm,)
    cd_bytes = jnp.dtype(cd).itemsize
    out_bytes = jnp.dtype(query.dtype).itemsize
    vmem_limit = _vmem_limit_bytes(tm, d_model, M_pad, d_pad, cd_bytes, out_bytes)

    kernel = functools.partial(_implicit_mem_kernel,
                               denom_lane=params["denom_lane"],
                               exp_dtype=exp_dtype)

    out2d = pl.pallas_call(
        kernel,
        out_shape=jax.ShapeDtypeStruct((rows_pad, d_pad), query.dtype),
        grid_spec=pl.GridSpec(
            grid=grid,
            in_specs=[
                pl.BlockSpec((tm, d_model), lambda i: (i, 0)),      # q row tile (pipelined)
                pl.BlockSpec((d_model, M_pad), lambda i: (0, 0)),   # keys_eff^T (resident)
                pl.BlockSpec((M_pad, d_pad), lambda i: (0, 0)),     # values_aug (resident)
                pl.BlockSpec((1, M_pad), lambda i: (0, 0)),         # pad-slot bias (resident)
            ],
            out_specs=pl.BlockSpec((tm, d_pad), lambda i: (i, 0)),
        ),
        compiler_params=pltpu.CompilerParams(
            dimension_semantics=("parallel",),     # megacore sharding on v7x
            vmem_limit_bytes=vmem_limit,           # footprint-derived, not a blind cap
        ),
    )(q2d, params["keff_t"], params["vaug"], params["bias"])

    # TODO(synk): for large B*T, consider emitting unpadded d_v (or bf16) output
    # to avoid the extra HBM traffic of this padded buffer + slice.
    return out2d[:rows, 1:1 + d_v].reshape(B, T, d_v)


def _reference(query, keys, values, w_q, w_k, w_v, d_k):
    q = query @ w_q.T
    k = keys @ w_k.T
    v = values @ w_v.T
    scores = (q @ k.T) / jnp.sqrt(jnp.float32(d_k))
    attn = jax.nn.softmax(scores, axis=-1)
    return attn @ v


if __name__ == "__main__":
    # Small, module-consistent shapes.
    B, T = 2, 8          # query batch / sequence
    d_model = 64
    d_k = d_v = 64
    M = 120              # deliberately not a multiple of 128 to exercise M-padding/masking

    key = jax.random.PRNGKey(0)
    k_q, k_keys, k_vals, k_wq, k_wk, k_wv, k_wo = jax.random.split(key, 7)

    query = jax.random.normal(k_q, (B, T, d_model), dtype=jnp.float32)
    keys = jax.random.normal(k_keys, (M, d_model), dtype=jnp.float32)
    values = jax.random.normal(k_vals, (M, d_model), dtype=jnp.float32)
    sequence_lengths = jnp.full((B,), T, dtype=jnp.int32)  # unused by the forward

    # nn.Linear(d_model, d_out, bias=False) weights: [d_out, d_in]
    w_scale = 1.0 / math.sqrt(d_model)
    w_q = jax.random.uniform(k_wq, (d_k, d_model), jnp.float32, -w_scale, w_scale)
    w_k = jax.random.uniform(k_wk, (d_k, d_model), jnp.float32, -w_scale, w_scale)
    w_v = jax.random.uniform(k_wv, (d_v, d_model), jnp.float32, -w_scale, w_scale)
    w_o = jax.random.uniform(k_wo, (d_v, d_model), jnp.float32, -w_scale, w_scale)

    # One-time fold of the static memory + projection weights (hoisted out of
    # the per-forward path), then the per-call Pallas forward.
    params = prepare_implicit_mem(keys, values, w_q, w_k, w_v, w_o, d_k=d_k)
    out = implicit_mem_forward(query, params, sequence_lengths)
    out = jax.block_until_ready(out)

    # Sanity check against a plain-JAX f32 reference; tolerance relaxed because
    # the kernel uses bf16 matmul operands, bf16 exp, and the approx reciprocal.
    ref = _reference(query.reshape(B * T, d_model), keys, values,
                     w_q, w_k, w_v, d_k).reshape(B, T, d_v)
    assert out.shape == (B, T, d_v)
    assert jnp.allclose(out, ref, atol=3e-2, rtol=3e-2), "mismatch vs reference"

    print("KERNEL_OK")
</pallas_src>

<mosaic_0001>
module attributes {stable_mosaic.version = 11 : i64} {
  func.func @_implicit_mem_kernel(%arg0: i32, %arg1: memref<16x64xbf16, #tpu.memory_space<vmem>>, %arg2: memref<64x128xbf16, #tpu.memory_space<vmem>>, %arg3: memref<128x128xbf16, #tpu.memory_space<vmem>>, %arg4: memref<1x128xf32, #tpu.memory_space<vmem>>, %arg5: memref<16x128xf32, #tpu.memory_space<vmem>>) attributes {dimension_semantics = [#tpu.dimension_semantics<parallel>], iteration_bounds = array<i64: 2>, scalar_prefetch = 0 : i64, scratch_operands = 0 : i64, tpu.core_type = #tpu.core_type<tc>, window_params = [{transform_indices = @transform_0, window_bounds = array<i64: 16, 64>}, {pipeline_mode = #tpu.pipeline_mode<synchronous>, transform_indices = @transform_1, window_bounds = array<i64: 64, 128>}, {pipeline_mode = #tpu.pipeline_mode<synchronous>, transform_indices = @transform_2, window_bounds = array<i64: 128, 128>}, {pipeline_mode = #tpu.pipeline_mode<synchronous>, transform_indices = @transform_3, window_bounds = array<i64: 1, 128>}, {transform_indices = @transform_4, window_bounds = array<i64: 16, 128>}]} {
    %c0 = arith.constant 0 : index
    %c0_0 = arith.constant 0 : index
    %0 = vector.load %arg1[%c0, %c0_0] : memref<16x64xbf16, #tpu.memory_space<vmem>>, vector<16x64xbf16>
    %c0_1 = arith.constant 0 : index
    %c0_2 = arith.constant 0 : index
    %1 = vector.load %arg2[%c0_1, %c0_2] : memref<64x128xbf16, #tpu.memory_space<vmem>>, vector<64x128xbf16>
    %cst = arith.constant dense<0.000000e+00> : vector<16x128xf32>
    %2 = tpu.matmul %0, %1, %cst {dimension_numbers = #tpu.dot_dimension_numbers<[1], [0], [0], [1], [0, 0, 1, 1], [], []>} : vector<16x64xbf16>, vector<64x128xbf16>, vector<16x128xf32> -> vector<16x128xf32>
    %c0_3 = arith.constant 0 : index
    %c0_4 = arith.constant 0 : index
    %3 = vector.load %arg4[%c0_3, %c0_4] : memref<1x128xf32, #tpu.memory_space<vmem>>, vector<1x128xf32>
    %4 = vector.broadcast %3 : vector<1x128xf32> to vector<16x128xf32>
    %5 = arith.addf %2, %4 : vector<16x128xf32>
    %cst_5 = arith.constant dense<0xFF800000> : vector<16xf32>
    %6 = vector.multi_reduction <maximumf>, %5, %cst_5 [1] : vector<16x128xf32> to vector<16xf32>
    %7 = vector.shape_cast %6 : vector<16xf32> to vector<16x1xf32>
    %8 = vector.broadcast %7 : vector<16x1xf32> to vector<16x128xf32>
    %9 = arith.subf %5, %8 : vector<16x128xf32>
    %10 = arith.truncf %9 : vector<16x128xf32> to vector<16x128xbf16>
    %11 = math.exp %10 : vector<16x128xbf16>
    %c0_6 = arith.constant 0 : index
    %c0_7 = arith.constant 0 : index
    %12 = vector.load %arg3[%c0_6, %c0_7] : memref<128x128xbf16, #tpu.memory_space<vmem>>, vector<128x128xbf16>
    %cst_8 = arith.constant dense<0.000000e+00> : vector<16x128xf32>
    %13 = tpu.matmul %11, %12, %cst_8 {dimension_numbers = #tpu.dot_dimension_numbers<[1], [0], [0], [1], [0, 0, 1, 1], [], []>} : vector<16x128xbf16>, vector<128x128xbf16>, vector<16x128xf32> -> vector<16x128xf32>
    %14 = vector.extract_strided_slice %13 {offsets = [0, 0], sizes = [16, 1], strides = [1, 1]} : vector<16x128xf32> to vector<16x1xf32>
    %15 = tpu.reciprocal %14 {approx = true} : vector<16x1xf32> -> vector<16x1xf32>
    %16 = vector.broadcast %15 : vector<16x1xf32> to vector<16x128xf32>
    %17 = arith.mulf %13, %16 : vector<16x128xf32>
    %c0_9 = arith.constant 0 : index
    %c0_10 = arith.constant 0 : index
    %18 = vector.load %arg5[%c0_9, %c0_10] : memref<16x128xf32, #tpu.memory_space<vmem>>, vector<16x128xf32>
    tpu.vector_store %arg5[%c0_9, %c0_10], %17 {strides = array<i32>} : memref<16x128xf32, #tpu.memory_space<vmem>>, vector<16x128xf32>,
    return
  }
  func.func @transform_0(%arg0: i32) -> (i32, i32) {
    %c0_i32 = arith.constant 0 : i32
    %c0_i32_0 = arith.constant 0 : i32
    return %arg0, %c0_i32 : i32, i32
  }
  func.func @transform_1(%arg0: i32) -> (i32, i32) {
    %c0_i32 = arith.constant 0 : i32
    %c0_i32_0 = arith.constant 0 : i32
    %c0_i32_1 = arith.constant 0 : i32
    return %c0_i32, %c0_i32_0 : i32, i32
  }
  func.func @transform_2(%arg0: i32) -> (i32, i32) {
    %c0_i32 = arith.constant 0 : i32
    %c0_i32_0 = arith.constant 0 : i32
    %c0_i32_1 = arith.constant 0 : i32
    return %c0_i32, %c0_i32_0 : i32, i32
  }
  func.func @transform_3(%arg0: i32) -> (i32, i32) {
    %c0_i32 = arith.constant 0 : i32
    %c0_i32_0 = arith.constant 0 : i32
    %c0_i32_1 = arith.constant 0 : i32
    return %c0_i32, %c0_i32_0 : i32, i32
  }
  func.func @transform_4(%arg0: i32) -> (i32, i32) {
    %c0_i32 = arith.constant 0 : i32
    %c0_i32_0 = arith.constant 0 : i32
    return %arg0, %c0_i32 : i32, i32
  }
}

</mosaic_0001>

<bundles_post_ra>
// kernel: tpu_custom_call.1
= control target key start
LH: loop header
LB: loop body
LE: loop exit
PB: predicated region body
PF: predicated region fallthrough
CT: control target
= control target key end

     0   :  { %9 = vsyncpa [#allocation3], 0  ;;  %s1193_s0 = inlined_call_operand.hbm [shape: bf16[32,64], index: 0, kind: input, shape index: {}]   ;;  %s1194_s1 = inlined_call_operand.hbm [shape: bf16[64,128], index: 1, kind: input, shape index: {}]   ;;  %s1195_s2 = inlined_call_operand.hbm [shape: bf16[128,128], index: 2, kind: input, shape index: {}]   ;;  %s1196_s3 = inlined_call_operand.vmem [shape: f32[1,128], index: 3, kind: input, shape index: {}]   ;;  %s1197_s4 = inlined_call_operand.hbm [shape: f32[32,128], index: 4, kind: output, shape index: {}]  }
   0x1   :  { %11 = vsyncpa [#allocation3 + $0x1], 0 }
   0x2   :  { %12 = vsyncpa [#allocation6], 0 }
   0x3   :  { %13 = vsyncpa [#allocation4], 0 }
   0x4   :  { %15 = vsyncpa [#allocation4 + $0x1], 0  ;;  %s946_s15 = smov 0   ;;  %s948_s16 = smov 0  }
   0x5   :  { %s950_s17 = smov 0   ;;  %s952_s18 = smov 0  }
   0x6 LB: > { %s967_s19 = sadd.s32 4294967295, %s908_s18   ;;  %s576_s20 = sadd.s32 4294967294, %s908_s18   ;;  %s908_s18 = sphi %s952_s18, %s1217_s18   ;;  %s904_s17 = sphi %s950_s17, %s1216_s17   ;;  %s900_s16 = sphi %s948_s16, %s1215_s16   ;;  %s896_s15 = sphi %s946_s15, %s1214_s15  }
   0x7   : > { %p41_p0 = scmp.ne.s32.totalorder %s900_s16, %s896_s15  ;;  %p1198_p1 = scmp.eq.s32.totalorder %s967_s19, 0 }
   0x8   : > { %p134_p3 = scmp.eq.s32.totalorder %s576_s20, 1  ;;  %p577_p5 = scmp.ge.s32.totalorder %s908_s18, 1 }
   0x9   : > { %p976_p4 = por %p1198_p1, %p41_p0  ;;  %p141_p7 = scmp.lt.s32.totalorder %s908_s18, 3 }
   0xa   : > { %p981_p6 = por %p134_p3, %p41_p0  ;;  %s910_s24 = smov [#allocation5]  }
   0xb   : > { %s1201_s21 = scalar_select %p976_p4, 1, 0 }
   0xc   : > { %s1202_s22 = scalar_select %p981_p6, 1, 0 }
   0xd   : > { %p986_p8 = pnand %p577_p5, %p141_p7  ;;  %s153_s25 = sshll.u32 %s910_s24, 4  ;;  %s990_s25 = int_to_ptr.vmem [resolvable:$true] %s153_s25 }
   0xe   : > { %s911_s27 = smov [#allocation7]   ;;  %s752_s5 = scalar_lea.hbm %s1194_s1, 512 }
   0xf   : > { %p669_p9 = pneg %p986_p8  ;;  %s166_s28 = sshll.u32 %s911_s27, 4  ;;  %s1001_s28 = int_to_ptr.vmem [resolvable:$true] %s166_s28 }
  0x10   : > { %p753_p12 = scmp.ne.s32.totalorder %s1194_s1, %s752_s5  ;;  %p759_p5 = scmp.lt.u32.totalorder %s752_s5, %s1194_s1 }
  0x11   : > { %p997_p11 = pnand %p669_p9, %p1198_p1 }
  0x13   : > { %p754_p13 = pneg %p997_p11 }
  0x15   : > { %p755_p0 = pnand %p754_p13, %p753_p12 }
  0x17   : > { %p756_p3 = pneg %p755_p0 }
  0x19   : > { %p761_p7 = pnand %p759_p5, %p756_p3 }
  0x1b   : > { %764 = shalt.err (!%p761_p7)
}
  0x1c   : > { %s765_s10 = scalar_lea.vmem %s990_s25, 512  ;;  %p773_p2 = scmp.lt.s32.totalorder %s990_s25, %s990_s25 }
  0x1d   : > { %p766_p9 = scmp.ne.s32.totalorder %s990_s25, %s765_s10  ;;  %p774_p12 = scmp.lt.s32.totalorder %s765_s10, %s765_s10 }
  0x1f   : > { %p768_p10 = pnand %p766_p9, %p754_p13  ;;  %p775_p0 = por %p774_p12, %p773_p2 }
  0x21   : > { %p769_p1 = pneg %p768_p10 }
  0x23   : > { %p776_p6 = pnand %p775_p0, %p769_p1 }
  0x25   : > { %779 = shalt.err (!%p776_p6)
}
  0x26   : > { %s912_s11 = smov 64   ;;  %s913_s12 = smov 4  }
  0x27   : > { %672 = dma.hbm_to_vmem [thread:$0]  (!%p997_p11), %s1194_s1, 512, %s990_s25, [#allocation6], %s912_s11, %s912_s11, %s913_s12  }
  0x28   : > { %s780_s27 = scalar_lea.hbm %s1195_s2, 1024 }
  0x29   : > { %p781_p1 = scmp.ne.s32.totalorder %s1195_s2, %s780_s27  ;;  %p787_p10 = scmp.lt.u32.totalorder %s780_s27, %s1195_s2 }
  0x2b   : > { %p783_p2 = pnand %p781_p1, %p754_p13 }
  0x2d   : > { %p784_p6 = pneg %p783_p2 }
  0x2f   : > { %p789_p3 = pnand %p787_p10, %p784_p6 }
  0x31   : > { %792 = shalt.err (!%p789_p3)
}
  0x32   : > { %s793_s25 = scalar_lea.vmem %s1001_s28, 1024  ;;  %p801_p12 = scmp.lt.s32.totalorder %s1001_s28, %s1001_s28 }
  0x33   : > { %p794_p5 = scmp.ne.s32.totalorder %s1001_s28, %s793_s25  ;;  %p802_p0 = scmp.lt.s32.totalorder %s793_s25, %s793_s25 }
  0x35   : > { %p796_p7 = pnand %p794_p5, %p754_p13  ;;  %p803_p1 = por %p802_p0, %p801_p12 }
  0x37   : > { %p797_p9 = pneg %p796_p7 }
  0x39   : > { %p804_p2 = pnand %p803_p1, %p797_p9 }
  0x3b   : > { %807 = shalt.err (!%p804_p2)
}
  0x3c   : > { %675 = dma.hbm_to_vmem [thread:$0]  (!%p997_p11), %s1195_s2, 1024, %s1001_s28, [#allocation6], %s912_s11, %s912_s11, %s913_s12  }
  0x3d   : > { %s1062_s26 = sadd.s32 1, %s908_s18   ;;  %s28_s9 = sadd.s32 1, %s904_s17 }
  0x3e   : > { %s25_s10 = ssub.s32 %s908_s18, %s1062_s26  ;;  %p35_p13 = scmp.ne.s32.totalorder %s904_s17, %s900_s16 }
  0x3f   : > { %p26_p6 = scmp.eq.s32.totalorder %s25_s10, 0  ;;  %p36_p10 = scmp.eq.s32.totalorder %s908_s18, 0 }
  0x40   : > { %p1205_p3 = scmp.eq.s32.totalorder %s967_s19, 1  ;;  %p686_p7 = scmp.lt.s32.totalorder %s908_s18, 2 }
  0x41   : > { %s1078_s14 = scalar_select %p26_p6, %s904_s17, %s28_s9  }
  0x42   : > { %p1072_p5 = por %p1205_p3, %p35_p13  ;;  %p37_p9 = por %p36_p10, %p35_p13 }
  0x43   : > { %s183_s20 = sand.u32 1, %s904_s17   ;;  %s609_s28 = sshll.u32 %s908_s18, 7 }
  0x44   : > { %s1206_s13 = scalar_select %p1072_p5, 1, 0 }
  0x45   : > { %s581_s24 = sshll.u32 %s183_s20, 3  ;;  %s1085_s30 = scalar_lea.hbm %s1193_s0, %s609_s28 }
  0x46   : > { %s187_s5 = scalar_lea.vmem [#allocation2], %s581_s24  ;;  %p1089_p11 = pnand %p686_p7, %p37_p9 }
  0x47   : > { %s194_s6 = sshll.u32 %s187_s5, 4  ;;  %s1093_s7 = scalar_lea.sflag [#allocation3], %s183_s20  ;;  %s1087_s6 = int_to_ptr.vmem [resolvable:$true] %s194_s6 }
  0x48   : > { %s808_s8 = scalar_lea.hbm %s1085_s30, 128  ;;  %p810_p0 = pneg %p1089_p11 }
  0x49   : > { %p809_p12 = scmp.ne.s32.totalorder %s1085_s30, %s808_s8  ;;  %s813_s24 = scalar_lea.hbm %s1193_s0, 256 }
  0x4a   : > { %p814_p13 = scmp.lt.u32.totalorder %s1085_s30, %s1193_s0  ;;  %p815_p6 = scmp.lt.u32.totalorder %s813_s24, %s808_s8 }
  0x4b   : > { %p811_p1 = pnand %p810_p0, %p809_p12  ;;  %p817_p3 = scmp.lt.u32.totalorder %s808_s8, %s1085_s30 }
  0x4c   : > { %p816_p10 = por %p815_p6, %p814_p13 }
  0x4d   : > { %p812_p2 = pneg %p811_p1 }
  0x4e   : > { %p818_p7 = por %p817_p3, %p816_p10 }
  0x50   : > { %p819_p9 = pnand %p818_p7, %p812_p2 }
  0x52   : > { %822 = shalt.err (!%p819_p9)
}
  0x53   : > { %s823_s20 = scalar_lea.vmem %s1087_s6, 128  ;;  %s914_s29 = smov [#allocation2]  }
  0x54   : > { %p824_p12 = scmp.ne.s32.totalorder %s1087_s6, %s823_s20  ;;  %s828_s5 = sshll.u32 %s914_s29, 4  ;;  %s829_s5 = int_to_ptr.vmem [resolvable:$false] %s828_s5 }
  0x55   : > { %s830_s9 = scalar_lea.vmem %s829_s5, 256  ;;  %p831_p4 = scmp.lt.s32.totalorder %s1087_s6, %s829_s5 }
  0x56   : > { %p826_p1 = pnand %p824_p12, %p810_p0  ;;  %p832_p13 = scmp.lt.s32.totalorder %s830_s9, %s823_s20 }
  0x58   : > { %p827_p5 = pneg %p826_p1  ;;  %p833_p6 = por %p832_p13, %p831_p4 }
  0x5a   : > { %p834_p10 = pnand %p833_p6, %p827_p5 }
  0x5c   : > { %837 = shalt.err (!%p834_p10)
}
  0x5d   : > { %679 = dma.hbm_to_vmem [thread:$0]  (!%p1089_p11), %s1085_s30, 128, %s1087_s6, %s1093_s7, %s912_s11, %s912_s11, %s913_s12  }
  0x5e   : > { %206 = sbr.rel (%p986_p8) target bundleno = 873 (0x369), region = 36  ;;  %s1127_s8 = sand.u32 (!%p986_p8), 1, %s900_s16  }
  0x5f   : > { %s585_s10 = sshll.u32 (!%p986_p8), %s1127_s8, 3  ;;  %s209_s24 = scalar_lea.sflag (!%p986_p8), [#allocation3], %s1127_s8 }
  0x60   : > { %s212_s28 = scalar_lea.vmem (!%p986_p8), [#allocation2], %s585_s10  ;;  %p1208_p4 = scmp.ne.s32.totalorder (!%p986_p8), %s1201_s21, 0 }
  0x65   : > { %883 = dma.done.wait (%p1208_p4), %s209_s24, 128  }
  0x66   : > { %885 = vsyncadd (%p1208_p4), %s209_s24, 4294967168  ;;  %p1209_p5 = scmp.eq.s32.totalorder %s967_s19, 0 }
  0x68   : > { %887 = dma.done.wait (%p1209_p5), [#allocation6], 1536   ;;  %p1210_p11 = pmov %p1209_p5 }
  0x69   : > { %v915_v0 = vmov 0.0   ;;  %vm916_vm0 = vmmov 0   ;;  %v733_v1 = vld [vmem:[#allocation5] sm:$0xff]   ;;  %v734_v2 = vld [vmem:[#allocation5 + $0x8] sm:$0xff]   ;;  %v735_v3 = vld [vmem:[#allocation5 + $0x10] sm:$0xff]   ;;  %vm294_vm1 = vcmask 523264  }
  0x6a   : > { %889 = vsyncadd (%p1210_p11), [#allocation6], 4294965760  ;;  %625 = vmatprep.subr.bf16.mxu0 %v915_v0  ;;  %633 = vmatprep.mubr.msk.bf16.mxu0 %vm916_vm0, %v915_v0  ;;  %v736_v4 = vld [vmem:[#allocation5 + $0x18] sm:$0xff]   ;;  %v738_v6 = vld [vmem:[#allocation7] sm:$0xff]   ;;  %v917_v28 = vmov 0   ;;  %s588_s11 = sshll.u32 %s1127_s8, 4 }
  0x6b   : > { %637 = vmatprep.subr.bf16.mxu1 %v915_v0  ;;  %653 = vmatprep.mubr.msk.bf16.mxu1 %vm916_vm0, %v915_v0  ;;  %v737_v5 = vld [vmem:[%s212_s28] sm:$0xff]   ;;  %v739_v7 = vld [vmem:[#allocation7 + $0x8] sm:$0xff]   ;;  %v742_v17 = vld [vmem:[#allocation7 + $0x20] sm:$0xff]   ;;  %s244_s12 = scalar_lea.vmem [#allocation8], %s588_s11  ;;  %s610_s6 = sshll.u32 %s967_s19, 8 }
  0x6c   : > { %626 = vmatpush3.bf16.msra.mxu0 %v733_v1  ;;  %638 = vmatpush3.bf16.msra.mxu1 %v738_v6  ;;  %v740_v8 = vld [vmem:[#allocation7 + $0x10] sm:$0xff]   ;;  %v741_v16 = vld [vmem:[#allocation7 + $0x18] sm:$0xff]   ;;  %v743_v18 = vld [vmem:[#allocation7 + $0x28] sm:$0xff]   ;;  %s484_s30 = sshll.u32 %s244_s12, 4  ;;  %s1149_s27 = scalar_lea.hbm %s1197_s4, %s610_s6  ;;  %s1144_s30 = int_to_ptr.vmem [resolvable:$true] %s484_s30 }
  0x6d   : > { %627 = vmatprep.subr.bf16.mxu0 %v915_v0  ;;  %639 = vmatprep.subr.bf16.mxu1 %v915_v0  ;;  %v589_v9 = vld [vmem:[%s1196_s3] ss:$0 sm:$0xff]  ;;  %v745_v20 = vld [vmem:[#allocation7 + $0x38] sm:$0xff]   ;;  %s471_s20 = scalar_lea.sflag [#allocation4], %s1127_s8  ;;  %s838_s29 = scalar_lea.vmem %s1144_s30, 256 }
  0x6e   : > { %v744_v19 = vld [vmem:[#allocation7 + $0x30] sm:$0xff]   ;;  %731 = vset.pattern.permute.xlu1 %v917_v28  ;;  %732 = vset.pattern.permute.xlu0 %v917_v28  ;;  %p839_p8 = scmp.ne.s32.totalorder %s1144_s30, %s838_s29  ;;  %p1211_p0 = scmp.ne.s32.totalorder %s1206_s13, 0 }
  0x6f   : > { %s918_s19 = smov [#allocation8]  }
  0x70   : > { %628 = vmatpush3.bf16.msra.mxu0 %v734_v2  ;;  %640 = vmatpush3.bf16.msra.mxu1 %v739_v7  ;;  %p840_p2 = pnand %p839_p8, %p1211_p0  ;;  %s842_s5 = sshll.u32 %s918_s19, 4  ;;  %s843_s5 = int_to_ptr.vmem [resolvable:$false] %s842_s5 }
  0x71   : > { %629 = vmatprep.subr.bf16.mxu0 %v915_v0  ;;  %641 = vmatprep.subr.bf16.mxu1 %v915_v0  ;;  %s844_s9 = scalar_lea.vmem %s843_s5, 512  ;;  %p845_p7 = scmp.lt.s32.totalorder %s1144_s30, %s843_s5 }
  0x72   : > { %p841_p3 = pneg %p840_p2  ;;  %p846_p9 = scmp.lt.s32.totalorder %s844_s9, %s838_s29 }
  0x74   : > { %630 = vmatpush3.bf16.msra.mxu0 %v735_v3  ;;  %642 = vmatpush3.bf16.msra.mxu1 %v740_v8  ;;  %p847_p12 = por %p846_p9, %p845_p7 }
  0x75   : > { %631 = vmatprep.subr.bf16.mxu0 %v915_v0  ;;  %643 = vmatprep.subr.bf16.mxu1 %v915_v0 }
  0x76   : > { %p848_p1 = pnand %p847_p12, %p841_p3 }
  0x78   : > { %632 = vmatpush3.bf16.msra.mxu0 %v736_v4  ;;  %644 = vmatpush3.bf16.msra.mxu1 %v741_v16 }
  0x79   : > { %645 = vmatprep.subr.bf16.mxu1 %v915_v0 }
  0x7b   : > { %634 = vmatmul.mubr.msk.bf16.vlgmr.msra.gmra.mrb[0].mxu0 %vm294_vm1, %v737_v5 }
  0x7c   : > { %646 = vmatpush3.bf16.msra.mxu1 %v742_v17 }
  0x7d   : > { %647 = vmatprep.subr.bf16.mxu1 %v915_v0 }
  0x80   : > { %648 = vmatpush3.bf16.msra.mxu1 %v743_v18 }
  0x81   : > { %649 = vmatprep.subr.bf16.mxu1 %v915_v0 }
  0x84   : > { %650 = vmatpush3.bf16.msra.mxu1 %v744_v19 }
  0x85   : > { %651 = vmatprep.subr.bf16.mxu1 %v915_v0 }
  0x88   : > { %652 = vmatpush3.bf16.msra.mxu1 %v745_v20 }
 0x14e   : > { %v332_v10 = vpop.f32.mrb[0].mxu0 }
 0x14f   : > { %v333_v11 = vadd.f32 %v589_v9, %v332_v10  ;;  %v635_v12 = vpop.f32.mrb[1].mxu0 }
 0x150   : > { %v335_v13 = vpop.f32.mrb[2].mxu0 }
 0x151   : > { %339 = vmax.xlane.f32.xlu0 %v333_v11  ;;  %v636_v14 = vpop.f32.mrb[3].mxu0  ;;  %v336_v15 = vadd.f32 %v589_v9, %v335_v13 }
 0x155   : > { %341 = vmax.xlane.f32.xlu0 %v336_v15 }
 0x1de   : > { %v340_v21 = vpop.xlane.xlu0 %339 }
 0x1df   : > { %v343_v23 = vsub.f32 %v333_v11, %v340_v21 }
 0x1e2   : > { %v342_v22 = vpop.xlane.xlu0 %341 }
 0x1e3   : > { %v344_v24 = vsub.f32 %v336_v15, %v342_v22 }
 0x1e5   : > { %v345_v25 = vpack.c.bf16 %v344_v24, %v343_v23 }
 0x1e7   : > { %v347_v26 = vmul.bf16 1069105081, %v345_v25 }
 0x1e9   : > { %746 = vpow.bf16 %v347_v26 }
 0x1f4   : > { %v747_v27 = vpop.eup %746 }
 0x1f5   : > { %654 = vmatmul.mubr.bf16.vlgmr.msra.gmra.mrb[0].mxu1 %v747_v27 }
 0x2c8   : > { %v447_v29 = vpop.f32.mrb[0].mxu1 }
 0x2c9   : > { %748 = vrcp.f32 %v447_v29  ;;  %v655_v30 = vpop.f32.mrb[1].mxu1 }
 0x2ca   : > { %v450_v31 = vpop.f32.mrb[2].mxu1 }
 0x2cb   : > { %v656_v32 = vpop.f32.mrb[3].mxu1  ;;  %750 = vrcp.f32 %v450_v31 }
 0x2d3   : > { %v749_v33 = vpop.eup %748 }
 0x2d4   : > { %458 = vperm.xlu1 %731, %v749_v33  }
 0x2d5   : > { %v751_v34 = vpop.eup %750 }
 0x2d8   : > { %463 = vperm.xlu1 %731, %v751_v34  }
 0x353   : > { %v459_v35 = vpop.permute.xlu1 %458 }
 0x354   : > { %v466_v36 = vmul.f32 %v459_v35, %v447_v29 }
 0x356   : > { %468 = vst [vmem:[%s244_s12] sm:$0xff] %v466_v36 }
 0x357   : > { %v464_v37 = vpop.permute.xlu1 %463 }
 0x358   : > { %v467_v38 = vmul.f32 %v464_v37, %v450_v31 }
 0x35a   : > { %469 = vst [vmem:[%s244_s12 + $0x8] sm:$0xff] %v467_v38 }
 0x35b   : > { %851 = shalt.err (!%p848_p1)
}
 0x35c   : > { %s852_s10 = scalar_lea.hbm %s1149_s27, 256  ;;  %s856_s21 = scalar_lea.hbm %s1197_s4, 512 }
 0x35d   : > { %p853_p13 = scmp.ne.s32.totalorder %s1149_s27, %s852_s10  ;;  %p857_p4 = scmp.lt.u32.totalorder %s1149_s27, %s1197_s4 }
 0x35e   : > { %p858_p5 = scmp.lt.u32.totalorder %s856_s21, %s852_s10  ;;  %p860_p8 = scmp.lt.u32.totalorder %s852_s10, %s1149_s27 }
 0x35f   : > { %p854_p6 = pnand %p853_p13, %p1211_p0 }
 0x360   : > { %p859_p11 = por %p858_p5, %p857_p4 }
 0x361   : > { %p855_p10 = pneg %p854_p6 }
 0x362   : > { %p861_p2 = por %p860_p8, %p859_p11 }
 0x364   : > { %p862_p3 = pnand %p861_p2, %p855_p10 }
 0x366   : > { %865 = shalt.err (!%p862_p3)
}
 0x367   : > { %s919_s12 = smov 128   ;;  %s920_s6 = smov 8  }
 0x368   : > { %667 = dma.vmem_to_hbm [thread:$0]  (%p1211_p0), %s1144_s30, 256, %s1149_s27, %s471_s20, %s919_s12, %s919_s12, %s920_s6  }
 0x369 PF: > { %s499_s25 = sand.u32 1, %s896_s15   ;;  %p1212_p7 = scmp.ne.s32.totalorder %s1202_s22, 0 }
 0x36a   : > { %p1213_p9 = scmp.ge.s32.totalorder %s908_s18, 2  ;;  %s500_s7 = scalar_lea.sflag [#allocation4], %s499_s25 }
 0x36c   : > { %p681_p12 = pnand %p1213_p9, %p1212_p7 }
 0x36e   : > { %891 = dma.done.wait (!%p681_p12), %s500_s7, 256  }
 0x36f   : > { %893 = vsyncadd (!%p681_p12), %s500_s7, 4294967040  ;;  %p18_p1 = scmp.ge.s32.totalorder %s1062_s26, 4   ;;  %s1214_s15 = smov %s900_s16 }
 0x370   : > { %s1215_s16 = smov %s904_s17  ;;  %s1216_s17 = smov %s1078_s14 }
 0x371   : > { %s1217_s18 = smov %s1062_s26  ;;  %20 = sbr.rel (!%p18_p1) target bundleno = 6 (0x6), region = 89 }
 0x378   :  { %505 = vsyncpa [#allocation3], 1 }
 0x379   :  { %507 = vsyncpa [#allocation3 + $0x1], 1 }
 0x37a   :  { %508 = vsyncpa [#allocation6], 1 }
 0x37b   :  { %509 = vsyncpa [#allocation4], 1 }
 0x37c   :  { %511 = vsyncpa [#allocation4 + $0x1], 1 }

</bundles_post_ra>
